<compile_context>
chip_gen: v7x
topology: tpu7x:2x2x1
jax: 0.10.0
libtpu: 0.0.40
codegen_flags: <defaults>
</compile_context>

<pallas_src>
import functools

import jax
import jax.numpy as jnp
from jax.experimental import pallas as pl
from jax.experimental.pallas import tpu as pltpu


def _round_up(n, m):
    return ((n + m - 1) // m) * m


def _nefe_kernel(x_ref, p_ref, o_ref, *, S, H1, H2, A, r1, r2, rb):
    """3 fused matmuls: x @ W1_big -> relu -> @ W2_big -> relu -> @ W3 (+ biases)."""
    x = x_ref[...]                                   # (TB, S), same dtype as slab
    mm_dtype = p_ref.dtype

    # Static views into the resident parameter slab (row-starts 8-aligned).
    w1 = p_ref[0:S, 0:H1]                            # blockdiag(fc1, fc1_prime)
    w2 = p_ref[r1:r1 + H1, 0:H2]                     # blockdiag(fc2, fc2_prime)
    w3 = p_ref[r2:r2 + H2, 0:A]                      # fc3
    b1 = p_ref[rb:rb + 1, 0:H1].astype(jnp.float32)
    b2 = p_ref[rb + 1:rb + 2, 0:H2].astype(jnp.float32)
    b3 = p_ref[rb + 2:rb + 3, 0:A].astype(jnp.float32)

    h = jnp.dot(x, w1, preferred_element_type=jnp.float32) + b1
    h = jnp.maximum(h, 0.0)                          # (TB, H1)  f32
    h = jnp.dot(h.astype(mm_dtype), w2, preferred_element_type=jnp.float32) + b2
    h = jnp.maximum(h, 0.0)                          # (TB, H2)  f32
    o = jnp.dot(h.astype(mm_dtype), w3, preferred_element_type=jnp.float32) + b3
    o_ref[...] = o.astype(o_ref.dtype)


def pack_params(params, *, dtype=jnp.float32):
    """Build the block-diagonal fused weights and pack everything into one slab.

    Slab layout (row-starts aligned to 8 sublanes, cols start at 0):
      rows [0, S)          cols [0, H1) : W1_big = blockdiag(w1, w1p)   (S,  H1)
      rows [r1, r1+H1)     cols [0, H2) : W2_big = blockdiag(w2, w2p)   (H1, H2)
      rows [r2, r2+H2)     cols [0, A)  : W3                            (H2, A)
      row  rb              cols [0, H1) : b1_big = concat(b1, b1p)
      row  rb+1            cols [0, H2) : b2_big = concat(b2, b2p)
      row  rb+2            cols [0, A)  : b3
    """
    w1, b1 = params["w1"], params["b1"]       # (S-6, 2S)
    w1p, b1p = params["w1p"], params["b1p"]   # (6, h_dim)
    w2, b2 = params["w2"], params["b2"]       # (2S, h5)
    w2p, b2p = params["w2p"], params["b2p"]   # (h_dim, 4*h5)
    w3, b3 = params["w3"], params["b3"]       # (h5 + 4*h5, A)

    s_ext, s2 = w1.shape
    h_dim = w1p.shape[1]
    h5, h4 = w2.shape[1], w2p.shape[1]
    A = w3.shape[1]
    S = s_ext + 6
    H1 = s2 + h_dim
    H2 = h5 + h4
    assert w3.shape[0] == H2, "fc3 in_features must equal concat width"

    # Block-diagonal fused weights (ext cols first, prop cols second -> matches
    # the concat order in the original module, so W3 stays as-is).
    w1_big = jnp.zeros((S, H1), jnp.float32)
    w1_big = w1_big.at[:s_ext, :s2].set(w1)
    w1_big = w1_big.at[s_ext:, s2:].set(w1p)
    b1_big = jnp.concatenate([b1, b1p])

    w2_big = jnp.zeros((H1, H2), jnp.float32)
    w2_big = w2_big.at[:s2, :h5].set(w2)
    w2_big = w2_big.at[s2:, h5:].set(w2p)
    b2_big = jnp.concatenate([b2, b2p])

    r1 = _round_up(S, 8)
    r2 = r1 + _round_up(H1, 8)
    rb = r2 + _round_up(H2, 8)
    R = rb + 8
    C = max(H1, H2, A)

    slab = jnp.zeros((R, C), jnp.float32)
    slab = slab.at[0:S, 0:H1].set(w1_big)
    slab = slab.at[r1:r1 + H1, 0:H2].set(w2_big)
    slab = slab.at[r2:r2 + H2, 0:A].set(w3)
    slab = slab.at[rb, 0:H1].set(b1_big)
    slab = slab.at[rb + 1, 0:H2].set(b2_big)
    slab = slab.at[rb + 2, 0:A].set(b3)
    slab = slab.astype(dtype)

    layout = dict(S=S, H1=H1, H2=H2, A=A, r1=r1, r2=r2, rb=rb)
    return slab, layout


def nefe_net(x, param_slab, layout, *, tb_max=2048):
    """Forward pass of NEFENet.  x: (B, state_size) or (state_size,)."""
    if x.ndim < 2:                      # mirrors `x.unsqueeze(0)` in the torch module
        x = x[None, :]
    x = x.astype(param_slab.dtype)      # bf16 at the boundary halves input DMA bytes
    B, S = x.shape
    assert S == layout["S"], "state_size mismatch between x and packed params"
    A = layout["A"]

    # Batch tile: one tile for modest B; for large B cap at ceil(B/2) (rounded to 8
    # sublanes) so the grid has >= 2 steps and v7x megacore splits work across both
    # TensorCores; never exceed tb_max (keeps double-buffered VMEM a few MiB).
    if B <= 1024:
        TB = B
    else:
        TB = min(tb_max, _round_up(pl.cdiv(B, 2), 8))
    grid = (pl.cdiv(B, TB),)

    kernel = functools.partial(_nefe_kernel, **layout)

    return pl.pallas_call(
        kernel,
        out_shape=jax.ShapeDtypeStruct((B, A), jnp.float32),
        grid=grid,
        in_specs=[
            pl.BlockSpec((TB, S), lambda i: (i, 0)),              # batch-tiled input
            pl.BlockSpec(param_slab.shape, lambda i: (0, 0)),     # resident param slab
        ],
        out_specs=pl.BlockSpec((TB, A), lambda i: (i, 0)),
        compiler_params=pltpu.CompilerParams(
            dimension_semantics=("parallel",)),                   # megacore on v7x
    )(x, param_slab)


def init_params(key, state_size, h_dim, action_size):
    """Deterministic init mimicking torch.nn.Linear defaults (uniform +-1/sqrt(fan_in)).
    Weights stored as (in_features, out_features) == torch weight transposed."""
    assert h_dim % 5 == 0, "h_dim must be divisible by 5 so concat width == h_dim"
    s_ext = state_size - 6
    s2 = 2 * state_size
    h5 = h_dim // 5
    h4 = 4 * h5
    keys = jax.random.split(key, 10)

    def lin(kw, kb, fan_in, fan_out):
        bound = 1.0 / jnp.sqrt(fan_in)
        w = jax.random.uniform(kw, (fan_in, fan_out), jnp.float32, -bound, bound)
        b = jax.random.uniform(kb, (fan_out,), jnp.float32, -bound, bound)
        return w, b

    w1, b1 = lin(keys[0], keys[1], s_ext, s2)              # fc1
    w1p, b1p = lin(keys[2], keys[3], 6, h_dim)              # fc1_prime
    w2, b2 = lin(keys[4], keys[5], s2, h5)                  # fc2
    w2p, b2p = lin(keys[6], keys[7], h_dim, h4)             # fc2_prime
    w3, b3 = lin(keys[8], keys[9], h5 + h4, action_size)    # fc3
    return dict(w1=w1, b1=b1, w1p=w1p, b1p=b1p,
                w2=w2, b2=b2, w2p=w2p, b2p=b2p, w3=w3, b3=b3)


def reference(x, p):
    if x.ndim < 2:
        x = x[None, :]
    xe, xp = x[:, :-6], x[:, -6:]
    e = jax.nn.relu(xe @ p["w1"] + p["b1"])
    q = jax.nn.relu(xp @ p["w1p"] + p["b1p"])
    e = jax.nn.relu(e @ p["w2"] + p["b2"])
    q = jax.nn.relu(q @ p["w2p"] + p["b2p"])
    h = jnp.concatenate([e, q], axis=1)
    return h @ p["w3"] + p["b3"]


if __name__ == "__main__":
    key = jax.random.PRNGKey(0)
    kx, kp, kx2 = jax.random.split(key, 3)

    # Small shapes consistent with the module: state_size=20 (14 extero + 6 proprio),
    # h_dim=40 (divisible by 5 -> concat width 8+32=40), action_size=6, batch=8.
    B, STATE, HDIM, ACT = 8, 20, 40, 6
    x = jax.random.normal(kx, (B, STATE), jnp.float32)
    params = init_params(kp, STATE, HDIM, ACT)

    # f32 path (matches the torch module's numerics).
    slab_f32, layout = pack_params(params, dtype=jnp.float32)
    out = jax.block_until_ready(nefe_net(x, slab_f32, layout))
    ref = reference(x, params)
    assert out.shape == (B, ACT)
    assert jnp.allclose(out, ref, atol=1e-4, rtol=1e-4), "f32 mismatch vs reference"

    # Multi-step grid path (grid >= 2, partial last tile, megacore split on v7x).
    xb = jax.random.normal(kx2, (2500, STATE), jnp.float32)
    outb = jax.block_until_ready(nefe_net(xb, slab_f32, layout))
    refb = reference(xb, params)
    assert jnp.allclose(outb, refb, atol=1e-4, rtol=1e-4), "tiled mismatch vs reference"

    # bf16 weight/input variant (halves HBM traffic & MXU passes; f32 accumulation).
    slab_bf16, _ = pack_params(params, dtype=jnp.bfloat16)
    out16 = jax.block_until_ready(nefe_net(x, slab_bf16, layout))
    assert jnp.allclose(out16, ref, atol=1e-1, rtol=1e-1), "bf16 mismatch vs reference"

    print("KERNEL_OK")
</pallas_src>

<mosaic_0001>
module attributes {stable_mosaic.version = 11 : i64} {
  func.func @_nefe_kernel(%arg0: i32, %arg1: memref<8x20xf32, #tpu.memory_space<vmem>>, %arg2: memref<152x80xf32, #tpu.memory_space<vmem>>, %arg3: memref<8x6xf32, #tpu.memory_space<vmem>>) attributes {dimension_semantics = [#tpu.dimension_semantics<parallel>], iteration_bounds = array<i64: 1>, scalar_prefetch = 0 : i64, scratch_operands = 0 : i64, tpu.core_type = #tpu.core_type<tc>, window_params = [{transform_indices = @transform_0, window_bounds = array<i64: 8, 20>}, {pipeline_mode = #tpu.pipeline_mode<synchronous>, transform_indices = @transform_1, window_bounds = array<i64: 152, 80>}, {transform_indices = @transform_2, window_bounds = array<i64: 8, 6>}]} {
    %c0 = arith.constant 0 : index
    %c0_0 = arith.constant 0 : index
    %0 = vector.load %arg1[%c0, %c0_0] : memref<8x20xf32, #tpu.memory_space<vmem>>, vector<8x20xf32>
    %c0_1 = arith.constant 0 : index
    %c0_2 = arith.constant 0 : index
    %1 = vector.load %arg2[%c0_1, %c0_2] : memref<152x80xf32, #tpu.memory_space<vmem>>, vector<20x80xf32>
    %c24 = arith.constant 24 : index
    %c0_3 = arith.constant 0 : index
    %2 = vector.load %arg2[%c24, %c0_3] : memref<152x80xf32, #tpu.memory_space<vmem>>, vector<80x40xf32>
    %c104 = arith.constant 104 : index
    %c0_4 = arith.constant 0 : index
    %3 = vector.load %arg2[%c104, %c0_4] : memref<152x80xf32, #tpu.memory_space<vmem>>, vector<40x6xf32>
    %c144 = arith.constant 144 : index
    %c0_5 = arith.constant 0 : index
    %4 = vector.load %arg2[%c144, %c0_5] : memref<152x80xf32, #tpu.memory_space<vmem>>, vector<1x80xf32>
    %c145 = arith.constant 145 : index
    %c0_6 = arith.constant 0 : index
    %5 = vector.load %arg2[%c145, %c0_6] : memref<152x80xf32, #tpu.memory_space<vmem>>, vector<1x40xf32>
    %c146 = arith.constant 146 : index
    %c0_7 = arith.constant 0 : index
    %6 = vector.load %arg2[%c146, %c0_7] : memref<152x80xf32, #tpu.memory_space<vmem>>, vector<1x6xf32>
    %cst = arith.constant dense<0.000000e+00> : vector<8x80xf32>
    %7 = tpu.matmul %0, %1, %cst {dimension_numbers = #tpu.dot_dimension_numbers<[1], [0], [0], [1], [0, 0, 1, 1], [], []>} : vector<8x20xf32>, vector<20x80xf32>, vector<8x80xf32> -> vector<8x80xf32>
    %8 = vector.broadcast %4 : vector<1x80xf32> to vector<8x80xf32>
    %9 = arith.addf %7, %8 : vector<8x80xf32>
    %cst_8 = arith.constant 0.000000e+00 : f32
    %10 = vector.broadcast %cst_8 : f32 to vector<8x80xf32>
    %11 = arith.maximumf %9, %10 : vector<8x80xf32>
    %cst_9 = arith.constant dense<0.000000e+00> : vector<8x40xf32>
    %12 = tpu.matmul %11, %2, %cst_9 {dimension_numbers = #tpu.dot_dimension_numbers<[1], [0], [0], [1], [0, 0, 1, 1], [], []>} : vector<8x80xf32>, vector<80x40xf32>, vector<8x40xf32> -> vector<8x40xf32>
    %13 = vector.broadcast %5 : vector<1x40xf32> to vector<8x40xf32>
    %14 = arith.addf %12, %13 : vector<8x40xf32>
    %cst_10 = arith.constant 0.000000e+00 : f32
    %15 = vector.broadcast %cst_10 : f32 to vector<8x40xf32>
    %16 = arith.maximumf %14, %15 : vector<8x40xf32>
    %cst_11 = arith.constant dense<0.000000e+00> : vector<8x6xf32>
    %17 = tpu.matmul %16, %3, %cst_11 {dimension_numbers = #tpu.dot_dimension_numbers<[1], [0], [0], [1], [0, 0, 1, 1], [], []>} : vector<8x40xf32>, vector<40x6xf32>, vector<8x6xf32> -> vector<8x6xf32>
    %18 = vector.broadcast %6 : vector<1x6xf32> to vector<8x6xf32>
    %19 = arith.addf %17, %18 : vector<8x6xf32>
    %c0_12 = arith.constant 0 : index
    %c0_13 = arith.constant 0 : index
    %20 = vector.load %arg3[%c0_12, %c0_13] : memref<8x6xf32, #tpu.memory_space<vmem>>, vector<8x6xf32>
    tpu.vector_store %arg3[%c0_12, %c0_13], %19 {strides = array<i32>} : memref<8x6xf32, #tpu.memory_space<vmem>>, vector<8x6xf32>,
    return
  }
  func.func @transform_0(%arg0: i32) -> (i32, i32) {
    %c0_i32 = arith.constant 0 : i32
    %c0_i32_0 = arith.constant 0 : i32
    return %arg0, %c0_i32 : i32, i32
  }
  func.func @transform_1(%arg0: i32) -> (i32, i32) {
    %c0_i32 = arith.constant 0 : i32
    %c0_i32_0 = arith.constant 0 : i32
    %c0_i32_1 = arith.constant 0 : i32
    return %c0_i32, %c0_i32_0 : i32, i32
  }
  func.func @transform_2(%arg0: i32) -> (i32, i32) {
    %c0_i32 = arith.constant 0 : i32
    %c0_i32_0 = arith.constant 0 : i32
    return %arg0, %c0_i32 : i32, i32
  }
}

</mosaic_0001>

<bundles_post_ra>
// kernel: tpu_custom_call.1
= control target key start
LH: loop header
LB: loop body
LE: loop exit
PB: predicated region body
PF: predicated region fallthrough
CT: control target
= control target key end

     0   :  { %7 = vsyncpa [#allocation3], 0  ;;  %s564_s0 = inlined_call_operand.hbm [shape: f32[8,20], index: 0, kind: input, shape index: {}]   ;;  %s565_s1 = inlined_call_operand.hbm [shape: f32[152,80], index: 1, kind: input, shape index: {}]   ;;  %s566_s2 = inlined_call_operand.hbm [shape: f32[8,6], index: 2, kind: output, shape index: {}]  }
   0x1   :  { %8 = vsyncpa [#allocation6], 0 }
   0x2   :  { %9 = vsyncpa [#allocation4], 0  ;;  %s495_s9 = smov [#allocation2]   ;;  %s496_s11 = smov [#allocation5]  }
   0x3   :  { %s16_s10 = sshll.u32 %s495_s9, 4  ;;  %s25_s12 = sshll.u32 %s496_s11, 4  ;;  %s17_s10 = int_to_ptr.vmem [resolvable:$true] %s16_s10  ;;  %s518_s12 = int_to_ptr.vmem [resolvable:$true] %s25_s12 }
   0x4   :  { %s423_s15 = scalar_lea.hbm %s564_s0, 128 }
   0x5   :  { %p424_p0 = scmp.ne.s32.totalorder %s564_s0, %s423_s15  ;;  %p427_p1 = scmp.lt.u32.totalorder %s423_s15, %s564_s0 }
   0x7   :  { %p429_p2 = pnand %p427_p1, %p424_p0 }
   0x9   :  { %432 = shalt.err (!%p429_p2)
}
   0xa   :  { %s433_s20 = scalar_lea.vmem %s17_s10, 128  ;;  %p438_p4 = scmp.lt.s32.totalorder %s17_s10, %s17_s10 }
   0xb   :  { %p434_p3 = scmp.ne.s32.totalorder %s17_s10, %s433_s20  ;;  %p439_p5 = scmp.lt.s32.totalorder %s433_s20, %s433_s20 }
   0xd   :  { %p440_p6 = por %p439_p5, %p438_p4 }
   0xf   :  { %p441_p7 = pnand %p440_p6, %p434_p3 }
  0x11   :  { %444 = shalt.err (!%p441_p7)
}
  0x12   :  { %19 = dma.hbm_to_vmem [thread:$0]  %s564_s0, 128, %s17_s10, [#allocation3]  }
  0x13   :  { %s445_s25 = scalar_lea.hbm %s565_s1, 2432 }
  0x14   :  { %p446_p8 = scmp.ne.s32.totalorder %s565_s1, %s445_s25  ;;  %p449_p9 = scmp.lt.u32.totalorder %s445_s25, %s565_s1 }
  0x16   :  { %p451_p10 = pnand %p449_p9, %p446_p8 }
  0x18   :  { %454 = shalt.err (!%p451_p10)
}
  0x19   :  { %s455_s30 = scalar_lea.vmem %s518_s12, 2432  ;;  %p460_p12 = scmp.lt.s32.totalorder %s518_s12, %s518_s12 }
  0x1a   :  { %p456_p11 = scmp.ne.s32.totalorder %s518_s12, %s455_s30  ;;  %p461_p13 = scmp.lt.s32.totalorder %s455_s30, %s455_s30 }
  0x1c   :  { %p462_p0 = por %p461_p13, %p460_p12 }
  0x1e   :  { %p463_p1 = pnand %p462_p0, %p456_p11 }
  0x20   :  { %466 = shalt.err (!%p463_p1)
}
  0x21   :  { %s497_s0 = smov 128   ;;  %s498_s3 = smov 8  }
  0x22   :  { %31 = dma.hbm_to_vmem [thread:$0]  %s565_s1, 2432, %s518_s12, [#allocation6], %s497_s0, %s497_s0, %s498_s3  }
  0x23   :  { %489 = dma.done.wait [#allocation3], 128  }
  0x24   :  { %490 = vsyncadd [#allocation3], 4294967168 }
  0x25   :  { %491 = dma.done.wait [#allocation6], 2432  }
  0x26   :  { %492 = vsyncadd [#allocation6], 4294964864  ;;  %v499_v0 = vmov 0.0|0.0   ;;  %vm500_vm0 = vmmov 0   ;;  %v501_v1 = vmov 0.0   ;;  %v39_v2 = vld [vmem:[#allocation5] sm:$0xff] }
  0x27   :  { %391 = vmatprep.subr.bf16.mxu0 %v499_v0  ;;  %352 = vmatprep.mubr.msk.f32.mxu0 %vm500_vm0, %v501_v1  ;;  %v40_v3 = vld [vmem:[#allocation5 + $0x8] sm:$0xff]  ;;  %v42_v5 = vld [vmem:[#allocation5 + $0x18] sm:$0xff]  ;;  %v43_v6 = vld [vmem:[#allocation5 + $0x20] sm:$0xff]  ;;  %vm68_vm1 = vcmask 1043456   ;;  %vm64_vm2 = vcmask 162816   ;;  %vm147_vm3 = vcmask 654336  }
  0x28   :  { %394 = vmatprep.subr.bf16.mxu1 %v499_v0  ;;  %375 = vmatprep.mubr.msk.f32.mxu1 %vm500_vm0, %v501_v1  ;;  %v392_v4 = vpack.c.bf16 %v40_v3, %v39_v2  ;;  %v395_v7 = vpack.c.bf16 %v43_v6, %v42_v5  ;;  %v44_v8 = vld [vmem:[#allocation5 + $0x28] sm:$0xff]  ;;  %v45_v9 = vld [vmem:[#allocation5 + $0x30] sm:$0xff]  ;;  %v38_v12 = vld [vmem:[#allocation2] sm:$0xff]  ;;  %vm226_vm4 = vcmask 326656   ;;  %s502_s1 = smov [#allocation7]   ;;  %vm300_vm5 = vcmask 48128  }
  0x29   :  { %v41_v10 = vld [vmem:[#allocation5 + $0x10] sm:$0xf]  ;;  %v398_v11 = vpack.c.bf16 %v45_v9, %v44_v8  ;;  %v46_v13 = vld [vmem:[#allocation5 + $0x38] sm:$0xff]  ;;  %v47_v14 = vld [vmem:[#allocation5 + $0x40] sm:$0xff]  ;;  %s308_s6 = sshll.u32 %s502_s1, 4  ;;  %s309_s6 = int_to_ptr.vmem [resolvable:$true] %s308_s6 }
  0x2a   :  { %393 = vmatpush3.bf16.msra.mxu0 %v392_v4  ;;  %396 = vmatpush3.bf16.msra.mxu1 %v395_v7  ;;  %v401_v15 = vpack.c.bf16 %v47_v14, %v46_v13  ;;  %v48_v16 = vld [vmem:[#allocation5 + $0x48] sm:$0xff]  ;;  %v49_v17 = vld [vmem:[#allocation5 + $0x50] sm:$0xff]  ;;  %v50_v19 = vld [vmem:[#allocation5 + $0x58] sm:$0xff]  ;;  %s467_s7 = scalar_lea.vmem %s309_s6, 128  ;;  %p472_p3 = scmp.lt.s32.totalorder %s309_s6, %s309_s6 }
  0x2b   :  { %350 = vmatprep.subr.mxu0 %v501_v1  ;;  %397 = vmatprep.subr.bf16.mxu1 %v499_v0  ;;  %v404_v18 = vpack.c.bf16 %v49_v17, %v48_v16  ;;  %v51_v20 = vld [vmem:[#allocation5 + $0x60] sm:$0xff]  ;;  %v52_v22 = vld [vmem:[#allocation5 + $0x68] sm:$0xff]  ;;  %v53_v23 = vld [vmem:[#allocation5 + $0x70] sm:$0xff]  ;;  %p468_p2 = scmp.ne.s32.totalorder %s309_s6, %s467_s7  ;;  %p473_p4 = scmp.lt.s32.totalorder %s467_s7, %s467_s7 }
  0x2c   :  { %v407_v21 = vpack.c.bf16 %v51_v20, %v50_v19  ;;  %v410_v24 = vpack.c.bf16 %v53_v23, %v52_v22  ;;  %v318_v25 = vld [vmem:[#allocation5 + $0x90] ss:$0 sm:$0xff]  ;;  %v54_v30 = vld [vmem:[#allocation5 + $0x78] sm:$0xff]  ;;  %v55_v31 = vld [vmem:[#allocation5 + $0x80] sm:$0xff] }
  0x2d   :  { %v413_v32 = vpack.c.bf16 %v55_v31, %v54_v30  ;;  %v56_v33 = vld [vmem:[#allocation5 + $0x88] sm:$0xff]  ;;  %v321_v34 = vld [vmem:[#allocation5 + $0x91] ss:$0 sm:$0xff]  ;;  %v323_v39 = vld [vmem:[#allocation5 + $0x92] ss:$0 sm:$0xff]  ;;  %p474_p5 = por %p473_p4, %p472_p3 }
  0x2e   :  { %351 = vmatpush3.msk.msra.mxu0 %vm68_vm1, %v41_v10  ;;  %399 = vmatpush3.bf16.msra.mxu1 %v398_v11 }
  0x2f   :  { %353 = vmatmul.mubr.msk.f32.vlgmr.msra.gmra.mrb[0].mxu0 %vm64_vm2, %v38_v12  ;;  %400 = vmatprep.subr.bf16.mxu1 %v499_v0  ;;  %p475_p6 = pnand %p474_p5, %p468_p2 }
  0x30   :  { %409 = vmatprep.subr.bf16.mxu0 %v499_v0  ;;  %388 = vmatprep.mubr.msk.f32.mxu0 %vm500_vm0, %v501_v1 }
  0x31   :  { %411 = vmatpush3.bf16.msra.mxu0 %v410_v24 }
  0x32   :  { %402 = vmatpush3.bf16.msra.mxu1 %v401_v15  ;;  %412 = vmatprep.subr.bf16.mxu0 %v499_v0 }
  0x33   :  { %403 = vmatprep.subr.bf16.mxu1 %v499_v0 }
  0x35   :  { %414 = vmatpush3.bf16.msra.mxu0 %v413_v32 }
  0x36   :  { %405 = vmatpush3.bf16.msra.mxu1 %v404_v18  ;;  %386 = vmatprep.subr.mxu0 %v501_v1 }
  0x37   :  { %406 = vmatprep.subr.bf16.mxu1 %v499_v0 }
  0x39   :  { %387 = vmatpush3.msra.mxu0 %v56_v33 }
  0x3a   :  { %408 = vmatpush3.bf16.msra.mxu1 %v407_v21 }
 0x102   :  { %v138_v26 = vpop.f32.mrb[0].mxu0 }
 0x103   :  { %v139_v27 = vadd.f32 %v318_v25, %v138_v26  ;;  %v354_v28 = vpop.f32.mrb[1].mxu0 }
 0x105   :  { %v142_v29 = vmax.f32 %v139_v27, 0.0 }
 0x107   :  { %376 = vmatmul.mubr.msk.f32.vlgmr.msra.gmra.mrb[0].mxu1 %vm147_vm3, %v142_v29 }
 0x1da   :  { %v217_v35 = vpop.f32.mrb[0].mxu1 }
 0x1db   :  { %v218_v36 = vadd.f32 %v321_v34, %v217_v35  ;;  %v377_v37 = vpop.f32.mrb[1].mxu1 }
 0x1dd   :  { %v221_v38 = vmax.f32 %v218_v36, 0.0 }
 0x1df   :  { %389 = vmatmul.mubr.msk.f32.vlgmr.msra.gmra.mrb[2].mxu0 %vm226_vm4, %v221_v38 }
 0x2b2   :  { %v296_v40 = vpop.f32.mrb[2].mxu0 }
 0x2b3   :  { %v297_v41 = vadd.f32 %v323_v39, %v296_v40  ;;  %v390_v42 = vpop.f32.mrb[3].mxu0 }
 0x2b5   :  { %301 = vst.msk [vmem:[#allocation7] sm:$0xff] %vm300_vm5, %v297_v41 }
 0x2b6   :  { %478 = shalt.err (!%p475_p6)
}
 0x2b7   :  { %s479_s10 = scalar_lea.hbm %s566_s2, 128 }
 0x2b8   :  { %p480_p7 = scmp.ne.s32.totalorder %s566_s2, %s479_s10  ;;  %p483_p8 = scmp.lt.u32.totalorder %s479_s10, %s566_s2 }
 0x2ba   :  { %p485_p9 = pnand %p483_p8, %p480_p7 }
 0x2bc   :  { %488 = shalt.err (!%p485_p9)
}
 0x2bd   :  { %311 = dma.vmem_to_hbm [thread:$0]  %s309_s6, 128, %s566_s2, [#allocation4]  }
 0x2be   :  { %493 = dma.done.wait [#allocation4], 128  }
 0x2bf   :  { %494 = vsyncadd [#allocation4], 4294967168 }
 0x2c0   :  { %315 = vsyncpa [#allocation3], 1 }
 0x2c1   :  { %316 = vsyncpa [#allocation6], 1 }
 0x2c2   :  { %317 = vsyncpa [#allocation4], 1 }

</bundles_post_ra>
